<compile_context>
chip_gen: v7x
topology: tpu7x:2x2x1
jax: 0.10.0
libtpu: 0.0.40
codegen_flags: <defaults>
</compile_context>

<pallas_src>
import jax
import jax.numpy as jnp
from jax.experimental import pallas as pl
from jax.experimental.pallas import tpu as pltpu

_GAUSS_TAPS = (0.05, 0.25, 0.4, 0.25, 0.05)
_CHARBONNIER_EPS = 1e-3


def _clamped_gauss_matrix(n):
    """(n, n) matrix M with (M @ v)[o] = sum_d taps[d] * v[clip(o + d - 2)].

    1-D 5-tap Gaussian with replicate ("edge") padding as a dense banded
    matrix, so the in-kernel convolution is a plain MXU matmul.
    """
    taps = jnp.asarray(_GAUSS_TAPS, dtype=jnp.float32)
    o = jnp.arange(n, dtype=jnp.int32)[:, None]   # output index
    i = jnp.arange(n, dtype=jnp.int32)[None, :]   # input index
    m = jnp.zeros((n, n), dtype=jnp.float32)
    for d in range(-2, 3):
        src = jnp.clip(o + d, 0, n - 1)
        m = m + taps[d + 2] * (src == i).astype(jnp.float32)
    return m


def _edge_operator_matrices(h, w):
    """A (h,h), B (w,w) such that laplacian(img) == img - A @ img @ B.

    conv_gauss(img) = M_H @ img @ M_W^T ; 4*even_mask*X = diag(2 e_H) X diag(2 e_W)
    => laplacian(img) = img - (M_H diag(2 e_H) M_H) @ img @ (M_W diag(2 e_W) M_W)^T
    """
    mh = _clamped_gauss_matrix(h)
    mw = _clamped_gauss_matrix(w)
    eh = (jnp.arange(h) % 2 == 0).astype(jnp.float32)
    ew = (jnp.arange(w) % 2 == 0).astype(jnp.float32)
    a = mh @ (2.0 * eh[:, None] * mh)          # M_H @ diag(2 e_H) @ M_H
    b = (mw @ (2.0 * ew[:, None] * mw)).T      # (M_W @ diag(2 e_W) @ M_W)^T
    return a, b


def _pick_pack_factor(nc, w):
    """Largest divisor G of nc with G*w <= 128 (lane packing for small W)."""
    if w >= 128:
        return 1
    best = 1
    for g in range(1, nc + 1):
        if nc % g == 0 and g * w <= 128:
            best = g
    return best


def _edge_loss_kernel(a_ref, b_ref, x_ref, y_ref, o_ref):
    """One packed (H, G*W) slab -> one partial Charbonnier sum."""
    # laplacian is linear: laplacian(x) - laplacian(y) = laplacian(x - y).
    d = x_ref[0].astype(jnp.float32) - y_ref[0].astype(jnp.float32)   # (H, Wp)
    # lap = d - A @ d @ B  (A/B are bf16 constants, f32 accumulation on MXU).
    t = jnp.dot(a_ref[...], d.astype(jnp.bfloat16),
                preferred_element_type=jnp.float32)
    t = jnp.dot(t.astype(jnp.bfloat16), b_ref[...],
                preferred_element_type=jnp.float32)
    lap = d - t
    eps2 = jnp.float32(_CHARBONNIER_EPS * _CHARBONNIER_EPS)
    charb = jnp.sqrt(lap * lap + eps2)
    # Independent per-step output block (no carried accumulator); write the
    # scalar broadcast over a full (8,128) tile so the store is unmasked.
    o_ref[...] = jnp.broadcast_to(jnp.sum(charb), o_ref.shape).astype(o_ref.dtype)


def _edge_loss_partial_sums(x_pack, y_pack, a_bf, b_bf):
    ng, h, wp = x_pack.shape
    itemsize = x_pack.dtype.itemsize

    # flops (2x per MAC) for the two matmuls + elementwise work.
    flops = ng * (2 * h * h * wp + 2 * h * wp * wp + 8 * h * wp)
    bytes_accessed = ((x_pack.size + y_pack.size) * itemsize
                      + (a_bf.size + b_bf.size) * 2
                      + ng * 8 * 128 * 4)

    # VMEM: 2 double-buffered input blocks + double-buffered bf16 constants
    # + double-buffered output tile, with 1.5x headroom. Clamp to v7x physical.
    in_block = h * wp * itemsize
    needed = (2 * 2 * in_block + 2 * (a_bf.size + b_bf.size) * 2
              + 2 * 8 * 128 * 4)
    vmem_limit = int(min(64 * 1024 * 1024,
                         max(32 * 1024 * 1024, (needed * 3) // 2)))

    out = pl.pallas_call(
        _edge_loss_kernel,
        out_shape=jax.ShapeDtypeStruct((ng, 8, 128), jnp.float32),
        grid_spec=pltpu.PrefetchScalarGridSpec(
            num_scalar_prefetch=0,
            grid=(ng,),
            in_specs=[
                # Constant operator matrices: constant index_map -> fetched
                # once, VMEM-resident for the whole grid.
                pl.BlockSpec((h, h), lambda i: (0, 0)),
                pl.BlockSpec((wp, wp), lambda i: (0, 0)),
                # One packed (H, G*W) slab of x and y per grid step.
                pl.BlockSpec((1, h, wp), lambda i: (i, 0, 0)),
                pl.BlockSpec((1, h, wp), lambda i: (i, 0, 0)),
            ],
            out_specs=pl.BlockSpec((1, 8, 128), lambda i: (i, 0, 0)),
        ),
        compiler_params=pltpu.CompilerParams(
            # Every grid step writes its own output block -> fully parallel
            # (lets v7x shard the plane axis across its two TensorCores).
            dimension_semantics=("parallel",),
            vmem_limit_bytes=vmem_limit,
        ),
        cost_estimate=pl.CostEstimate(
            flops=flops,
            transcendentals=ng * h * wp,
            bytes_accessed=bytes_accessed,
        ),
    )(a_bf, b_bf, x_pack, y_pack)
    return out[:, 0, 0]


class EdgeLoss:
    """Pallas-TPU port of the PyTorch EdgeLoss module (forward pass)."""

    def __init__(self):
        self.eps = _CHARBONNIER_EPS

    def __call__(self, x, y):
        assert x.shape == y.shape and x.ndim == 4, "expected NCHW inputs"
        n, c, h, w = x.shape
        nc = n * c
        g = _pick_pack_factor(nc, w)
        ng = nc // g

        a, b = _edge_operator_matrices(h, w)
        if g > 1:
            # Block-diagonal column operator: packing G planes along lanes.
            b = jnp.kron(jnp.eye(g, dtype=jnp.float32), b)

        def pack(t):
            t = t.reshape(nc, h, w)
            if g > 1:
                # (ng, G, H, W) -> (ng, H, G*W): lane-dense slabs for the MXU.
                t = t.reshape(ng, g, h, w).transpose(0, 2, 1, 3).reshape(ng, h, g * w)
            return t

        partial = _edge_loss_partial_sums(
            pack(x), pack(y),
            a.astype(jnp.bfloat16), b.astype(jnp.bfloat16))
        return jnp.sum(partial) / jnp.float32(x.size)


# ----------------------------------------------------------------------------
# Pure-JAX reference (mirrors the PyTorch module exactly, f32) for self-check.
# ----------------------------------------------------------------------------
def _edge_loss_ref(x, y, eps=_CHARBONNIER_EPS):
    k1d = jnp.asarray(_GAUSS_TAPS, dtype=jnp.float32)
    k2d = jnp.outer(k1d, k1d)

    def conv_gauss(img):  # (N, C, H, W), replicate pad + 5x5 conv
        h, w = img.shape[2], img.shape[3]
        p = jnp.pad(img, ((0, 0), (0, 0), (2, 2), (2, 2)), mode="edge")
        out = jnp.zeros_like(img)
        for a in range(5):
            for b in range(5):
                out = out + k2d[a, b] * p[:, :, a:a + h, b:b + w]
        return out

    def laplacian(img):
        filt = conv_gauss(img)
        newf = jnp.zeros_like(filt)
        newf = newf.at[:, :, ::2, ::2].set(filt[:, :, ::2, ::2] * 4.0)
        return img - conv_gauss(newf)

    d = laplacian(x) - laplacian(y)
    return jnp.mean(jnp.sqrt(d * d + eps * eps))


if __name__ == "__main__":
    key = jax.random.PRNGKey(0)
    k1, k2 = jax.random.split(key)
    # The reference module's Gaussian weight is (1,1,5,5) with groups=1, so its
    # forward implies single-channel NCHW inputs.  Shape chosen so the test
    # exercises lane packing (G=2) AND a multi-step parallel grid (ng=2).
    shape = (4, 1, 16, 48)
    x = jax.random.normal(k1, shape, dtype=jnp.float32)
    y = jax.random.normal(k2, shape, dtype=jnp.float32)

    loss_mod = EdgeLoss()
    out = jax.block_until_ready(loss_mod(x, y))

    ref = jax.block_until_ready(_edge_loss_ref(x, y))
    # bf16 MXU operands (f32 accumulation) -> low-order-bit differences vs. the
    # f32 reference; the operator itself is mathematically identical.
    assert jnp.allclose(out, ref, rtol=5e-3, atol=1e-5), (out, ref)
    print("KERNEL_OK")
</pallas_src>

<mosaic_0001>
module attributes {stable_mosaic.version = 11 : i64} {
  func.func @_edge_loss_kernel(%arg0: i32, %arg1: memref<16x16xbf16, #tpu.memory_space<vmem>>, %arg2: memref<96x96xbf16, #tpu.memory_space<vmem>>, %arg3: memref<1x16x96xf32, #tpu.memory_space<vmem>>, %arg4: memref<1x16x96xf32, #tpu.memory_space<vmem>>, %arg5: memref<1x8x128xf32, #tpu.memory_space<vmem>>) attributes {dimension_semantics = [#tpu.dimension_semantics<parallel>], iteration_bounds = array<i64: 2>, scalar_prefetch = 0 : i64, scratch_operands = 0 : i64, tpu.core_type = #tpu.core_type<tc>, window_params = [{pipeline_mode = #tpu.pipeline_mode<synchronous>, transform_indices = @transform_0, window_bounds = array<i64: 16, 16>}, {pipeline_mode = #tpu.pipeline_mode<synchronous>, transform_indices = @transform_1, window_bounds = array<i64: 96, 96>}, {transform_indices = @transform_2, window_bounds = array<i64: 1, 16, 96>}, {transform_indices = @transform_3, window_bounds = array<i64: 1, 16, 96>}, {transform_indices = @transform_4, window_bounds = array<i64: 1, 8, 128>}]} {
    %c0 = arith.constant 0 : index
    %c0_0 = arith.constant 0 : index
    %c0_1 = arith.constant 0 : index
    %0 = vector.load %arg3[%c0, %c0_0, %c0_1] : memref<1x16x96xf32, #tpu.memory_space<vmem>>, vector<1x16x96xf32>
    %1 = vector.shape_cast %0 : vector<1x16x96xf32> to vector<16x96xf32>
    %c0_2 = arith.constant 0 : index
    %c0_3 = arith.constant 0 : index
    %c0_4 = arith.constant 0 : index
    %2 = vector.load %arg4[%c0_2, %c0_3, %c0_4] : memref<1x16x96xf32, #tpu.memory_space<vmem>>, vector<1x16x96xf32>
    %3 = vector.shape_cast %2 : vector<1x16x96xf32> to vector<16x96xf32>
    %4 = arith.subf %1, %3 : vector<16x96xf32>
    %c0_5 = arith.constant 0 : index
    %c0_6 = arith.constant 0 : index
    %5 = vector.load %arg1[%c0_5, %c0_6] : memref<16x16xbf16, #tpu.memory_space<vmem>>, vector<16x16xbf16>
    %6 = arith.truncf %4 : vector<16x96xf32> to vector<16x96xbf16>
    %cst = arith.constant dense<0.000000e+00> : vector<16x96xf32>
    %7 = tpu.matmul %5, %6, %cst {dimension_numbers = #tpu.dot_dimension_numbers<[1], [0], [0], [1], [0, 0, 1, 1], [], []>} : vector<16x16xbf16>, vector<16x96xbf16>, vector<16x96xf32> -> vector<16x96xf32>
    %8 = arith.truncf %7 : vector<16x96xf32> to vector<16x96xbf16>
    %c0_7 = arith.constant 0 : index
    %c0_8 = arith.constant 0 : index
    %9 = vector.load %arg2[%c0_7, %c0_8] : memref<96x96xbf16, #tpu.memory_space<vmem>>, vector<96x96xbf16>
    %cst_9 = arith.constant dense<0.000000e+00> : vector<16x96xf32>
    %10 = tpu.matmul %8, %9, %cst_9 {dimension_numbers = #tpu.dot_dimension_numbers<[1], [0], [0], [1], [0, 0, 1, 1], [], []>} : vector<16x96xbf16>, vector<96x96xbf16>, vector<16x96xf32> -> vector<16x96xf32>
    %11 = arith.subf %4, %10 : vector<16x96xf32>
    %12 = arith.mulf %11, %11 : vector<16x96xf32>
    %cst_10 = arith.constant 9.99999997E-7 : f32
    %13 = vector.broadcast %cst_10 : f32 to vector<16x96xf32>
    %14 = arith.addf %12, %13 : vector<16x96xf32>
    %15 = math.sqrt %14 : vector<16x96xf32>
    %16 = vector.shape_cast %15 : vector<16x96xf32> to vector<1x16x96xf32>
    %cst_11 = arith.constant dense<0.000000e+00> : vector<1xf32>
    %17 = vector.multi_reduction <add>, %16, %cst_11 [1, 2] : vector<1x16x96xf32> to vector<1xf32>
    %18 = vector.shape_cast %17 : vector<1xf32> to vector<1x1x1xf32>
    %19 = vector.extract %18[0, 0, 0] : f32 from vector<1x1x1xf32>
    %20 = vector.broadcast %19 : f32 to vector<1x8x128xf32>
    %c0_12 = arith.constant 0 : index
    %c0_13 = arith.constant 0 : index
    %c0_14 = arith.constant 0 : index
    %21 = vector.load %arg5[%c0_12, %c0_13, %c0_14] : memref<1x8x128xf32, #tpu.memory_space<vmem>>, vector<1x8x128xf32>
    tpu.vector_store %arg5[%c0_12, %c0_13, %c0_14], %20 {strides = array<i32>} : memref<1x8x128xf32, #tpu.memory_space<vmem>>, vector<1x8x128xf32>,
    return
  }
  func.func @transform_0(%arg0: i32) -> (i32, i32) {
    %c0_i32 = arith.constant 0 : i32
    %c0_i32_0 = arith.constant 0 : i32
    %c0_i32_1 = arith.constant 0 : i32
    return %c0_i32, %c0_i32_0 : i32, i32
  }
  func.func @transform_1(%arg0: i32) -> (i32, i32) {
    %c0_i32 = arith.constant 0 : i32
    %c0_i32_0 = arith.constant 0 : i32
    %c0_i32_1 = arith.constant 0 : i32
    return %c0_i32, %c0_i32_0 : i32, i32
  }
  func.func @transform_2(%arg0: i32) -> (i32, i32, i32) {
    %c0_i32 = arith.constant 0 : i32
    %c0_i32_0 = arith.constant 0 : i32
    %c0_i32_1 = arith.constant 0 : i32
    return %arg0, %c0_i32, %c0_i32_0 : i32, i32, i32
  }
  func.func @transform_3(%arg0: i32) -> (i32, i32, i32) {
    %c0_i32 = arith.constant 0 : i32
    %c0_i32_0 = arith.constant 0 : i32
    %c0_i32_1 = arith.constant 0 : i32
    return %arg0, %c0_i32, %c0_i32_0 : i32, i32, i32
  }
  func.func @transform_4(%arg0: i32) -> (i32, i32, i32) {
    %c0_i32 = arith.constant 0 : i32
    %c0_i32_0 = arith.constant 0 : i32
    %c0_i32_1 = arith.constant 0 : i32
    return %arg0, %c0_i32, %c0_i32_0 : i32, i32, i32
  }
}

</mosaic_0001>

<bundles_post_ra>
// kernel: tpu_custom_call.1
= control target key start
LH: loop header
LB: loop body
LE: loop exit
PB: predicated region body
PF: predicated region fallthrough
CT: control target
= control target key end

     0   :  { %s1257_s0 = inlined_call_operand.hbm [shape: bf16[16,16], index: 0, kind: input, shape index: {}]   ;;  %s1258_s1 = inlined_call_operand.hbm [shape: bf16[96,96], index: 1, kind: input, shape index: {}]   ;;  %s1259_s2 = inlined_call_operand.hbm [shape: f32[2,16,96], index: 2, kind: input, shape index: {}]   ;;  %s1260_s3 = inlined_call_operand.hbm [shape: f32[2,16,96], index: 3, kind: input, shape index: {}]   ;;  %s1261_s4 = inlined_call_operand.hbm [shape: f32[2,8,128], index: 4, kind: output, shape index: {}]  }
   0x1   :  { %1273 = sst [smem:[#allocation16_spill]] %s1257_s0 }
   0x2   :  { %1274 = sst [smem:[#allocation17_spill]] %s1259_s2 }
   0x3   :  { %9 = vsyncpa [#allocation3], 0 }
   0x4   :  { %10 = vsyncpa [#allocation6], 0 }
   0x5   :  { %11 = vsyncpa [#allocation4], 0 }
   0x6   :  { %13 = vsyncpa [#allocation4 + $0x1], 0  ;;  %s973_s15 = smov 0   ;;  %s975_s16 = smov 0  }
   0x7   :  { %s977_s17 = smov 0   ;;  %s979_s18 = smov 0  }
   0x8 LB: > { %1275 = sst [smem:[#allocation14_spill]] %s931_s17  ;;  %s994_s19 = sadd.s32 4294967295, %s935_s18   ;;  %s935_s18 = sphi %s979_s18, %s1308_s18   ;;  %s931_s17 = sphi %s977_s17, %s1305_s17   ;;  %s927_s16 = sphi %s975_s16, %s1307_s16   ;;  %s923_s15 = sphi %s973_s15, %s1306_s15  }
   0x9   : > { %s591_s20 = sadd.s32 4294967294, %s935_s18   ;;  %s998_s21 = sadd.s32 1, %s935_s18  }
   0xa   : > { %s68_s22 = sadd.s32 1, %s931_s17  ;;  %s65_s23 = ssub.s32 %s935_s18, %s998_s21 }
   0xb   : > { %p75_p0 = scmp.ne.s32.totalorder %s931_s17, %s927_s16  ;;  %p66_p1 = scmp.eq.s32.totalorder %s65_s23, 0 }
   0xc   : > { %p76_p2 = scmp.eq.s32.totalorder %s935_s18, 0  ;;  %p81_p3 = scmp.ne.s32.totalorder %s927_s16, %s923_s15 }
   0xd   : > { %p1262_p4 = scmp.eq.s32.totalorder %s994_s19, 0  ;;  %p131_p7 = scmp.eq.s32.totalorder %s994_s19, 1 }
   0xe   : > { %s1010_s24 = scalar_select %p66_p1, %s931_s17, %s68_s22  }
   0xf   : > { %p1012_p5 = por %p76_p2, %p75_p0  ;;  %p1018_p6 = por %p1262_p4, %p81_p3 }
  0x10   : > { %1276 = sst [smem:[#allocation15_spill]] %s1010_s24  ;;  %p137_p8 = scmp.eq.s32.totalorder %s591_s20, 1 }
  0x11   : > { %s1277_s25 = scalar_select %p1012_p5, 1, 0 }
  0x12   : > { %s1278_s26 = scalar_select %p1018_p6, 1, 0 }
  0x13   : > { %p592_p9 = scmp.ge.s32.totalorder %s935_s18, 1  ;;  %p144_p10 = scmp.lt.s32.totalorder %s935_s18, 3 }
  0x14   : > { %p1025_p11 = por %p131_p7, %p75_p0  ;;  %p1029_p12 = por %p137_p8, %p81_p3 }
  0x15   : > { %p1033_p13 = pnand %p592_p9, %p144_p10  ;;  %s937_s30 = smov [#allocation2]  }
  0x16   : > { %s1279_s27 = scalar_select %p1025_p11, 1, 0 }
  0x17   : > { %s1280_s28 = scalar_select %p1029_p12, 1, 0 }
  0x18   : > { %s1281_s29 = scalar_select %p1033_p13, 1, 0 }
  0x19   : > { %p670_p1 = pneg %p1033_p13  ;;  %s156_s5 = sshll.u32 %s937_s30, 4  ;;  %s157_s5 = int_to_ptr.vmem [resolvable:$true] %s156_s5 }
  0x1a   : > { %s183_s7 = sand.u32 1, %s935_s18   ;;  %s1283_s0 = sld [smem:[#allocation16_spill]] }
  0x1b   : > { %p1041_p2 = pnand %p670_p1, %p1262_p4 }
  0x1d   : > { %p1268_p8 = pneg %p1041_p2 }
  0x20   : > { %s745_s10 = scalar_lea.hbm %s1283_s0, 128 }
  0x21   : > { %p746_p7 = scmp.ne.s32.totalorder %s1283_s0, %s745_s10  ;;  %p752_p1 = scmp.lt.u32.totalorder %s745_s10, %s1283_s0 }
  0x23   : > { %p748_p9 = pnand %p1268_p8, %p746_p7 }
  0x25   : > { %p749_p10 = pneg %p748_p9 }
  0x27   : > { %p754_p0 = pnand %p752_p1, %p749_p10 }
  0x29   : > { %757 = shalt.err (!%p754_p0)
}
  0x2a   : > { %s758_s20 = scalar_lea.vmem %s157_s5, 128  ;;  %p766_p11 = scmp.lt.s32.totalorder %s157_s5, %s157_s5 }
  0x2b   : > { %p759_p4 = scmp.ne.s32.totalorder %s157_s5, %s758_s20  ;;  %p767_p6 = scmp.lt.s32.totalorder %s758_s20, %s758_s20 }
  0x2d   : > { %p761_p3 = pnand %p759_p4, %p1268_p8  ;;  %p768_p13 = por %p767_p6, %p766_p11 }
  0x2f   : > { %p762_p12 = pneg %p761_p3 }
  0x31   : > { %p769_p5 = pnand %p768_p13, %p762_p12 }
  0x33   : > { %772 = shalt.err (!%p769_p5)
}
  0x34   : > { %s1266_s22 = smov 64   ;;  %s1267_s23 = smov 4  }
  0x35   : > { %673 = dma.hbm_to_vmem [thread:$0]  (!%p1041_p2), %s1283_s0, 128, %s157_s5, [#allocation3], %s1266_s22, %s1266_s22, %s1267_s23  }
  0x36   : > { %p1284_p4 = scmp.ne.s32.totalorder %s1277_s25, 0  ;;  %p1285_p6 = scmp.lt.s32.totalorder %s935_s18, 2 }
  0x37   : > { %s185_s10 = sand.u32 1, %s931_s17   ;;  %s621_s12 = sshll.u32 %s935_s18, 8 }
  0x38   : > { %p1077_p11 = pnand %p1285_p6, %p1284_p4  ;;  %s1082_s11 = sshll.u32 %s185_s10, 4 }
  0x39   : > { %s1287_s2 = sld [smem:[#allocation17_spill]]  ;;  %s187_s25 = scalar_lea.vmem [#allocation7], %s1082_s11 }
  0x3a   : > { %s1286_s9 = scalar_select %p1077_p11, 1, 0 }
  0x3b   : > { %s194_s5 = sshll.u32 %s187_s25, 4  ;;  %s1095_s30 = scalar_lea.sflag [#allocation3], %s183_s7  ;;  %s1093_s5 = int_to_ptr.vmem [resolvable:$true] %s194_s5 }
  0x3c   : > { %p1270_p12 = pneg %p1077_p11 }
  0x3f   : > { %s1090_s20 = scalar_lea.hbm %s1287_s2, %s621_s12  ;;  %s778_s14 = scalar_lea.hbm %s1287_s2, 512 }
  0x40   : > { %s773_s8 = scalar_lea.hbm %s1090_s20, 256  ;;  %p779_p3 = scmp.lt.u32.totalorder %s1090_s20, %s1287_s2 }
  0x41   : > { %p774_p5 = scmp.ne.s32.totalorder %s1090_s20, %s773_s8  ;;  %p780_p7 = scmp.lt.u32.totalorder %s778_s14, %s773_s8 }
  0x42   : > { %p782_p10 = scmp.lt.u32.totalorder %s773_s8, %s1090_s20 }
  0x43   : > { %p776_p13 = pnand %p1270_p12, %p774_p5  ;;  %p781_p9 = por %p780_p7, %p779_p3 }
  0x45   : > { %p777_p0 = pneg %p776_p13  ;;  %p783_p1 = por %p782_p10, %p781_p9 }
  0x47   : > { %p784_p4 = pnand %p783_p1, %p777_p0 }
  0x49   : > { %787 = shalt.err (!%p784_p4)
}
  0x4a   : > { %s788_s7 = scalar_lea.vmem %s1093_s5, 256  ;;  %s940_s25 = smov [#allocation7]  }
  0x4b   : > { %p789_p6 = scmp.ne.s32.totalorder %s1093_s5, %s788_s7  ;;  %s793_s10 = sshll.u32 %s940_s25, 4  ;;  %s794_s10 = int_to_ptr.vmem [resolvable:$false] %s793_s10 }
  0x4c   : > { %s795_s22 = scalar_lea.vmem %s794_s10, 512  ;;  %p796_p8 = scmp.lt.s32.totalorder %s1093_s5, %s794_s10 }
  0x4d   : > { %p791_p5 = pnand %p789_p6, %p1270_p12  ;;  %p797_p3 = scmp.lt.s32.totalorder %s795_s22, %s788_s7 }
  0x4f   : > { %p792_p13 = pneg %p791_p5  ;;  %p798_p7 = por %p797_p3, %p796_p8 }
  0x51   : > { %p799_p9 = pnand %p798_p7, %p792_p13 }
  0x53   : > { %802 = shalt.err (!%p799_p9)
}
  0x54   : > { %s941_s23 = smov 128   ;;  %s942_s8 = smov 8  }
  0x55   : > { %680 = dma.hbm_to_vmem [thread:$0]  (!%p1077_p11), %s1090_s20, 256, %s1093_s5, %s1095_s30, %s941_s23, %s941_s23, %s942_s8  }
  0x56   : > { %s943_s13 = smov [#allocation5]   ;;  %s1131_s10 = scalar_lea.hbm %s1260_s3, %s621_s12 }
  0x57   : > { %s169_s14 = sshll.u32 %s943_s13, 4  ;;  %s803_s2 = scalar_lea.hbm %s1258_s1, 768  ;;  %s170_s14 = int_to_ptr.vmem [resolvable:$true] %s169_s14 }
  0x58   : > { %p804_p8 = scmp.ne.s32.totalorder %s1258_s1, %s803_s2  ;;  %p1288_p0 = pneg %p1041_p2 }
  0x59   : > { %p810_p4 = scmp.lt.u32.totalorder %s803_s2, %s1258_s1 }
  0x5a   : > { %p806_p10 = pnand %p804_p8, %p1288_p0 }
  0x5c   : > { %p807_p1 = pneg %p806_p10 }
  0x5e   : > { %p812_p6 = pnand %p810_p4, %p807_p1 }
  0x60   : > { %815 = shalt.err (!%p812_p6)
}
  0x61   : > { %s816_s12 = scalar_lea.vmem %s170_s14, 768  ;;  %p1289_p13 = pmov %p1288_p0 }
  0x62   : > { %p817_p5 = scmp.ne.s32.totalorder %s170_s14, %s816_s12  ;;  %p824_p9 = scmp.lt.s32.totalorder %s170_s14, %s170_s14 }
  0x63   : > { %p825_p12 = scmp.lt.s32.totalorder %s816_s12, %s816_s12 }
  0x64   : > { %p819_p3 = pnand %p817_p5, %p1289_p13 }
  0x65   : > { %p826_p11 = por %p825_p12, %p824_p9 }
  0x66   : > { %p820_p7 = pneg %p819_p3 }
  0x68   : > { %p827_p0 = pnand %p826_p11, %p820_p7 }
  0x6a   : > { %830 = shalt.err (!%p827_p0)
}
  0x6b   : > { %s1290_s0 = smov 4   ;;  %s1291_s17 = smov 64  }
  0x6c   : > { %676 = dma.hbm_to_vmem [thread:$0]  (!%p1041_p2), %s1258_s1, 768, %s170_s14, [#allocation6], %s1291_s17, %s1291_s17, %s1290_s0  }
  0x6d   : > { %s208_s13 = scalar_lea.vmem [#allocation8], %s1082_s11  ;;  %s831_s25 = scalar_lea.hbm %s1131_s10, 256 }
  0x6e   : > { %s215_s7 = sshll.u32 %s208_s13, 4  ;;  %p832_p11 = scmp.ne.s32.totalorder %s1131_s10, %s831_s25  ;;  %s1157_s7 = int_to_ptr.vmem [resolvable:$true] %s215_s7 }
  0x6f   : > { %p1292_p12 = scmp.ne.s32.totalorder %s1286_s9, 0  ;;  %s836_s20 = scalar_lea.hbm %s1260_s3, 512 }
  0x70   : > { %p837_p4 = scmp.lt.u32.totalorder %s1131_s10, %s1260_s3  ;;  %p838_p6 = scmp.lt.u32.totalorder %s836_s20, %s831_s25 }
  0x71   : > { %p1293_p8 = pneg %p1292_p12  ;;  %p840_p5 = scmp.lt.u32.totalorder %s831_s25, %s1131_s10 }
  0x72   : > { %p839_p2 = por %p838_p6, %p837_p4 }
  0x73   : > { %p834_p10 = pnand %p832_p11, %p1293_p8 }
  0x74   : > { %p841_p13 = por %p840_p5, %p839_p2 }
  0x75   : > { %p835_p1 = pneg %p834_p10 }
  0x77   : > { %p842_p3 = pnand %p841_p13, %p835_p1 }
  0x79   : > { %845 = shalt.err (!%p842_p3)
}
  0x7a   : > { %s846_s11 = scalar_lea.vmem %s1157_s7, 256  ;;  %p1294_p9 = pmov %p1293_p8 }
  0x7b   : > { %p847_p7 = scmp.ne.s32.totalorder %s1157_s7, %s846_s11  ;;  %s944_s14 = smov [#allocation8]  }
  0x7c   : > { %s851_s0 = sshll.u32 %s944_s14, 4  ;;  %s852_s0 = int_to_ptr.vmem [resolvable:$false] %s851_s0 }
  0x7d   : > { %p849_p0 = pnand %p847_p7, %p1294_p9  ;;  %s853_s17 = scalar_lea.vmem %s852_s0, 512 }
  0x7e   : > { %p854_p8 = scmp.lt.s32.totalorder %s1157_s7, %s852_s0  ;;  %p855_p10 = scmp.lt.s32.totalorder %s853_s17, %s846_s11 }
  0x7f   : > { %p850_p11 = pneg %p849_p0 }
  0x80   : > { %p856_p4 = por %p855_p10, %p854_p8 }
  0x82   : > { %p857_p6 = pnand %p856_p4, %p850_p11 }
  0x84   : > { %860 = shalt.err (!%p857_p6)
}
  0x85   : > { %683 = dma.hbm_to_vmem [thread:$0]  (!%p1292_p12), %s1131_s10, 256, %s1157_s7, %s1095_s30, %s941_s23, %s941_s23, %s942_s8  }
  0x86   : > { %p1295_p1 = scmp.ne.s32.totalorder %s1281_s29, 0 }
  0x87   : > { %p1296_p2 = scmp.eq.s32.totalorder (!%p1295_p1), %s994_s19, 0 }
  0x88   : > { %227 = sbr.rel (%p1295_p1) target bundleno = 834 (0x342), region = 36 }
  0x8f   : > { %906 = dma.done.wait (%p1296_p2), [#allocation3], 128   ;;  %p1297_p5 = pmov %p1296_p2 }
  0x90   : > { %p1298_p13 = pmov %p1296_p2 }
  0x91   : > { %908 = vsyncadd (%p1297_p5), [#allocation3], 4294967168 }
  0x92   : > { %910 = dma.done.wait (%p1298_p13), [#allocation6], 768   ;;  %p1299_p3 = pmov %p1296_p2 }
  0x93   : > { %s237_s9 = sand.u32 1, %s994_s19   ;;  %s1198_s30 = sand.u32 1, %s927_s16  }
  0x94   : > { %912 = vsyncadd (%p1299_p3), [#allocation6], 4294966528  ;;  %s605_s29 = sshll.u32 %s1198_s30, 4  ;;  %s238_s23 = scalar_lea.sflag [#allocation3], %s237_s9 }
  0x95   : > { %s241_s8 = scalar_lea.vmem [#allocation7], %s605_s29  ;;  %p1300_p12 = scmp.ne.s32.totalorder %s1278_s26, 0 }
  0x97   : > { %914 = dma.done.wait (%p1300_p12), %s238_s23, 512  }
  0x98   : > { %916 = vsyncadd (%p1300_p12), %s238_s23, 4294966784  ;;  %v945_v0 = vmov 0.0   ;;  %vm946_vm0 = vmmov 0   ;;  %v281_v1 = vld [vmem:[%s241_s8] sm:$0xff]  ;;  %v282_v2 = vld [vmem:[%s241_s8 + $0x8] sm:$0xff]  ;;  %s250_s10 = scalar_lea.vmem [#allocation8], %s605_s29 }
  0x99   : > { %632 = vmatprep.subr.bf16.mxu0 %v945_v0  ;;  %634 = vmatprep.mubr.msk.bf16.mxu0 %vm946_vm0, %v945_v0  ;;  %v283_v3 = vld [vmem:[%s250_s10] sm:$0xff]  ;;  %v284_v4 = vld [vmem:[%s250_s10 + $0x8] sm:$0xff]  ;;  %vm295_vm1 = vcmask 130048   ;;  %vm389_vm2 = vcmask 785408   ;;  %s607_s26 = sshll.u32 %s1198_s30, 3  ;;  %s618_s13 = sshll.u32 %s994_s19, 7 }
  0x9a   : > { %638 = vmatprep.subr.bf16.mxu1 %v945_v0  ;;  %650 = vmatprep.mubr.msk.bf16.mxu1 %vm946_vm0, %v945_v0  ;;  %v285_v5 = vsub.f32 %v281_v1, %v283_v3  ;;  %v286_v6 = vsub.f32 %v282_v2, %v284_v4  ;;  %v735_v7 = vld [vmem:[#allocation5] sm:$0xff]   ;;  %v734_v9 = vld [vmem:[#allocation2] sm:$0xff]   ;;  %v736_v10 = vld [vmem:[#allocation5 + $0x8] sm:$0xff]   ;;  %s279_s2 = scalar_lea.vmem [#allocation9], %s607_s26  ;;  %s1215_s22 = scalar_lea.hbm %s1261_s4, %s618_s13 }
  0x9b   : > { %639 = vmatpush3.bf16.msra.mxu1 %v735_v7  ;;  %v737_v11 = vld [vmem:[#allocation5 + $0x10] sm:$0xff]   ;;  %v738_v12 = vld [vmem:[#allocation5 + $0x18] sm:$0xff]   ;;  %v739_v13 = vld [vmem:[#allocation5 + $0x20] sm:$0xff]   ;;  %s482_s24 = sshll.u32 %s279_s2, 4  ;;  %s469_s20 = scalar_lea.sflag [#allocation4], %s1198_s30  ;;  %s1210_s24 = int_to_ptr.vmem [resolvable:$true] %s482_s24 }
  0x9c   : > { %v289_v8 = vpack.c.bf16 %v286_v6, %v285_v5  ;;  %640 = vmatprep.subr.bf16.mxu1 %v945_v0  ;;  %v740_v14 = vld [vmem:[#allocation5 + $0x28] sm:$0xff]   ;;  %s861_s5 = scalar_lea.vmem %s1210_s24, 128  ;;  %p1301_p9 = scmp.ne.s32.totalorder %s1279_s27, 0 }
  0x9d   : > { %p862_p7 = scmp.ne.s32.totalorder %s1210_s24, %s861_s5  ;;  %s947_s19 = smov [#allocation9]  }
  0x9e   : > { %633 = vmatpush3.bf16.msra.mxu0 %v289_v8  ;;  %s865_s12 = sshll.u32 %s947_s19, 4  ;;  %s866_s12 = int_to_ptr.vmem [resolvable:$false] %s865_s12 }
  0x9f   : > { %641 = vmatpush3.bf16.msra.mxu1 %v736_v10  ;;  %p863_p0 = pnand %p862_p7, %p1301_p9  ;;  %s867_s11 = scalar_lea.vmem %s866_s12, 256 }
  0xa0   : > { %642 = vmatprep.subr.bf16.mxu1 %v945_v0  ;;  %p868_p8 = scmp.lt.s32.totalorder %s1210_s24, %s866_s12  ;;  %p869_p10 = scmp.lt.s32.totalorder %s867_s11, %s861_s5 }
  0xa1   : > { %635 = vmatmul.mubr.msk.bf16.vlgmr.msra.gmra.mrb[0].mxu0 %vm295_vm1, %v734_v9  ;;  %p864_p11 = pneg %p863_p0 }
  0xa2   : > { %p870_p4 = por %p869_p10, %p868_p8 }
  0xa3   : > { %643 = vmatpush3.bf16.msra.mxu1 %v737_v11 }
  0xa4   : > { %644 = vmatprep.subr.bf16.mxu1 %v945_v0  ;;  %p871_p6 = pnand %p870_p4, %p864_p11 }
  0xa7   : > { %645 = vmatpush3.bf16.msra.mxu1 %v738_v12 }
  0xa8   : > { %646 = vmatprep.subr.bf16.mxu1 %v945_v0 }
  0xab   : > { %647 = vmatpush3.bf16.msra.mxu1 %v739_v13 }
  0xac   : > { %648 = vmatprep.subr.bf16.mxu1 %v945_v0 }
  0xaf   : > { %649 = vmatpush3.bf16.msra.mxu1 %v740_v14 }
 0x174   : > { %v333_v15 = vpop.f32.mrb[0].mxu0 }
 0x175   : > { %v636_v16 = vpop.f32.mrb[1].mxu0 }
 0x176   : > { %v336_v17 = vpop.f32.mrb[2].mxu0 }
 0x177   : > { %v340_v18 = vpack.c.bf16 %v336_v17, %v333_v15  ;;  %v637_v19 = vpop.f32.mrb[3].mxu0 }
 0x179   : > { %651 = vmatmul.mubr.msk.bf16.vlgmr.msra.gmra.mrb[0].mxu1 %vm389_vm2, %v340_v18 }
 0x24c   : > { %v427_v20 = vpop.f32.mrb[0].mxu1 }
 0x24d   : > { %v434_v21 = vsub.f32 %v285_v5, %v427_v20  ;;  %v652_v22 = vpop.f32.mrb[1].mxu1 }
 0x24e   : > { %v430_v23 = vpop.f32.mrb[2].mxu1 }
 0x24f   : > { %v436_v24 = vmul.f32 %v434_v21, %v434_v21  ;;  %v435_v25 = vsub.f32 %v286_v6, %v430_v23  ;;  %v653_v26 = vpop.f32.mrb[3].mxu1 }
 0x251   : > { %v438_v27 = vadd.f32 1e-06, %v436_v24  ;;  %v437_v28 = vmul.f32 %v435_v25, %v435_v25 }
 0x253   : > { %741 = vrsqrt.f32 %v438_v27  ;;  %v439_v29 = vadd.f32 1e-06, %v437_v28  ;;  %vm442_vm3 = vcmp.eq.f32.partialorder %v438_v27, inf  ;;  %v445_v33 = vand.u32 2147483648, %v438_v27 }
 0x254   : > { %vm444_vm4 = vcmp.eq.f32.partialorder %v438_v27, 0.0 }
 0x255   : > { %743 = vrsqrt.f32 %v439_v29  ;;  %vm449_vm5 = vcmp.eq.f32.partialorder %v439_v29, inf  ;;  %v452_v37 = vand.u32 2147483648, %v439_v29  ;;  %vm451_vm6 = vcmp.eq.f32.partialorder %v439_v29, 0.0 }
 0x25d   : > { %v742_v30 = vpop.eup %741 }
 0x25e   : > { %v441_v31 = vmul.f32 %v742_v30, %v438_v27 }
 0x25f   : > { %v744_v32 = vpop.eup %743 }
 0x260   : > { %v443_v34 = vsel %vm442_vm3, %v438_v27, %v441_v31  ;;  %v448_v35 = vmul.f32 %v744_v32, %v439_v29 }
 0x261   : > { %v446_v36 = vsel %vm444_vm4, %v445_v33, %v443_v34 }
 0x262   : > { %v450_v38 = vsel %vm449_vm5, %v439_v29, %v448_v35  ;;  %v454_v40 = vsel %vm389_vm2, %v446_v36, 0.0 }
 0x263   : > { %v453_v39 = vsel %vm451_vm6, %v452_v37, %v450_v38 }
 0x264   : > { %v455_v41 = vsel %vm389_vm2, %v453_v39, 0.0 }
 0x265   : > { %v456_v42 = vadd.f32 %v455_v41, %v454_v40 }
 0x267   : > { %457 = vadd.xlane.f32.xlu0 %v456_v42 }
 0x2f4   : > { %v458_v43 = vpop.xlane.xlu0 %457 }
 0x2f5   : > { %v459_v44 = vrot.slane %v458_v43, 4 }
 0x2f7   : > { %v460_v45 = vadd.f32 %v459_v44, %v458_v43 }
 0x2f9   : > { %v461_v46 = vrot.slane %v460_v45, 2 }
 0x2fb   : > { %v462_v47 = vadd.f32 %v461_v46, %v460_v45 }
 0x2fd   : > { %v463_v48 = vrot.slane %v462_v47, 1 }
 0x2ff   : > { %v464_v49 = vadd.f32 %v463_v48, %v462_v47 }
 0x301   : > { %654 = vpush %v464_v49 }
 0x332   : > { %s655_s7 = spop %654 }
 0x333   : > { %v466_v50 = vstv %s655_s7 }
 0x334   : > { %467 = vst [vmem:[%s279_s2] sm:$0xff] %v466_v50 }
 0x335   : > { %874 = shalt.err (!%p871_p6)
}
 0x336   : > { %s875_s14 = scalar_lea.hbm %s1215_s22, 128  ;;  %s879_s9 = scalar_lea.hbm %s1261_s4, 256 }
 0x337   : > { %p876_p1 = scmp.ne.s32.totalorder %s1215_s22, %s875_s14  ;;  %p880_p13 = scmp.lt.u32.totalorder %s1215_s22, %s1261_s4 }
 0x338   : > { %p881_p3 = scmp.lt.u32.totalorder %s879_s9, %s875_s14  ;;  %p883_p7 = scmp.lt.u32.totalorder %s875_s14, %s1215_s22 }
 0x339   : > { %p877_p2 = pnand %p876_p1, %p1301_p9 }
 0x33a   : > { %p882_p12 = por %p881_p3, %p880_p13 }
 0x33b   : > { %p878_p5 = pneg %p877_p2 }
 0x33c   : > { %p884_p0 = por %p883_p7, %p882_p12 }
 0x33e   : > { %p885_p11 = pnand %p884_p0, %p878_p5 }
 0x340   : > { %888 = shalt.err (!%p885_p11)
}
 0x341   : > { %668 = dma.vmem_to_hbm [thread:$0]  (%p1301_p9), %s1210_s24, 128, %s1215_s22, %s469_s20  }
 0x342 PF: > { %s494_s23 = sand.u32 1, %s923_s15   ;;  %p1302_p8 = scmp.ne.s32.totalorder %s1280_s28, 0 }
 0x343   : > { %p1303_p10 = scmp.ge.s32.totalorder %s935_s18, 2  ;;  %s495_s8 = scalar_lea.sflag [#allocation4], %s494_s23 }
 0x345   : > { %p685_p4 = pnand %p1303_p10, %p1302_p8 }
 0x347   : > { %918 = dma.done.wait (!%p685_p4), %s495_s8, 128  }
 0x348   : > { %920 = vsyncadd (!%p685_p4), %s495_s8, 4294967168  ;;  %s1304_s10 = sld [smem:[#allocation14_spill]]  ;;  %s1305_s17 = sld [smem:[#allocation15_spill]] }
 0x349   : > { %p16_p6 = scmp.ge.s32.totalorder %s998_s21, 4   ;;  %s1306_s15 = smov %s927_s16 }
 0x34a   : > { %s1308_s18 = smov %s998_s21 }
 0x34b   :  { %18 = sbr.rel (!%p16_p6) target bundleno = 8 (0x8), region = 99 }
 0x34e   : > { %s1307_s16 = smov %s1304_s10 }
 0x352   :  { %500 = vsyncpa [#allocation3], 1 }
 0x353   :  { %502 = vsyncpa [#allocation3 + $0x1], 1 }
 0x354   :  { %503 = vsyncpa [#allocation6], 1 }
 0x355   :  { %504 = vsyncpa [#allocation4], 1 }
 0x356   :  { %506 = vsyncpa [#allocation4 + $0x1], 1 }

</bundles_post_ra>
